<compile_context>
chip_gen: v7x
topology: tpu7x:2x2x1
jax: 0.10.0
libtpu: 0.0.40
codegen_flags: <defaults>
</compile_context>

<pallas_src>
import math

import jax
import jax.numpy as jnp
from jax.experimental import pallas as pl
from jax.experimental.pallas import tpu as pltpu


def _round_up(n, m):
    return ((n + m - 1) // m) * m


def _tpu_params(*semantics):
    # Only attach Mosaic compiler params when actually lowering for TPU; the
    # CPU-interpret fallback used by the test harness ignores/doesn't need them.
    if jax.default_backend() == "tpu":
        return pltpu.CompilerParams(dimension_semantics=semantics)
    return None


# ---------------------------------------------------------------------------
# Pass 1: global sum-of-squares (for complex_normalize's pwr = 2*mean(x^2)).
# ---------------------------------------------------------------------------
def _sumsq_kernel(x_ref, ssq_ref):
    @pl.when(pl.program_id(0) == 0)
    def _():
        ssq_ref[0, 0] = jnp.float32(0.0)

    xv = x_ref[...].astype(jnp.float32)
    ssq_ref[0, 0] = ssq_ref[0, 0] + jnp.sum(xv * xv)


# ---------------------------------------------------------------------------
# Pass 2: fused elementwise channel (normalize/denormalize cancelled).
#   x_ref, n_ref, o_ref : (2, BR, 128)   row 0 = real half, row 1 = imag half
#   h_ref               : (BR, 128)      fading magnitude, shared by real/imag
#   scale_ref           : (1,) SMEM      scale = sigma * sqrt(pwr)
# ---------------------------------------------------------------------------
def _awgn_kernel(scale_ref, x_ref, n_ref, o_ref):
    scale = scale_ref[0]
    o_ref[...] = x_ref[...] + n_ref[...] * scale


def _rayleigh_kernel(scale_ref, x_ref, n_ref, h_ref, o_ref):
    scale = scale_ref[0]
    h = h_ref[...]
    x = x_ref[...]
    n = n_ref[...]
    o_ref[0] = x[0] * h + n[0] * scale
    o_ref[1] = x[1] * h + n[1] * scale


def channel_forward(x, chan_param, *, seed=0, chan_type="awgn", avg_pwr=False,
                    block_rows=512):
    """JAX/Pallas equivalent of Channel.forward(input, chan_param, avg_pwr=False)."""
    if avg_pwr:
        # TODO(synk): avg_pwr=True path (power=1, rescale by sqrt(avg_pwr*2)) not implemented.
        raise NotImplementedError("avg_pwr=True path not implemented")

    orig_shape = x.shape
    orig_dtype = x.dtype
    # TODO(synk): bf16 HBM passthrough (upcast in-kernel) would halve I/O on v6e/v7x.
    flat = jnp.asarray(x, jnp.float32).reshape(-1)
    L = flat.shape[0]
    assert L % 2 == 0, "flattened length must be even (complex pairing)"
    Lh = L // 2

    if chan_type in (0, "none"):
        # TODO(synk): PyTorch forward() has no return branch for chan_type 'none';
        # complex_forward is identity there, so return the input unchanged.
        return x

    # --- sublane/lane-dense layout: each half -> (rows_pad, 128), stacked -----
    rows = pl.cdiv(Lh, 128)
    br = min(block_rows, _round_up(rows, 8))          # block rows (multiple of 8)
    rows_pad = _round_up(rows, br)
    pad = rows_pad * 128 - Lh
    halves = jnp.stack([flat[:Lh], flat[Lh:]])        # (2, Lh)
    if pad:
        halves = jnp.pad(halves, ((0, 0), (0, pad)))  # zero pad -> sumsq unaffected
    x2 = halves.reshape(2, rows_pad, 128)

    grid = (rows_pad // br,)
    slab_spec = pl.BlockSpec((2, br, 128), lambda i: (0, i, 0))

    # --- pass 1: sumsq -> pwr -> single fused scale scalar --------------------
    sumsq = pl.pallas_call(
        _sumsq_kernel,
        out_shape=jax.ShapeDtypeStruct((1, 1), jnp.float32),
        grid=grid,
        in_specs=[pl.BlockSpec((2, br, 128), lambda i: (0, i, 0))],
        out_specs=pl.BlockSpec((1, 1), lambda i: (0, 0),
                               memory_space=pltpu.MemorySpace.SMEM),
        compiler_params=_tpu_params("arbitrary"),
    )(x2)[0, 0]

    pwr = 2.0 * sumsq / jnp.float32(L)
    sigma = jnp.sqrt(
        1.0 / (2.0 * jnp.power(10.0, jnp.asarray(chan_param, jnp.float32) / 10.0)))
    scale = (sigma * jnp.sqrt(pwr)).reshape(1)        # sigma * sqrt(pwr), one scalar

    # --- noise / fading (statistically equivalent to torch.normal) ------------
    key = jax.random.PRNGKey(seed)
    smem_spec = pl.BlockSpec(memory_space=pltpu.MemorySpace.SMEM)

    if chan_type in (1, "awgn"):
        noise = jax.random.normal(key, (2, rows_pad, 128), dtype=jnp.float32)
        kernel = _awgn_kernel
        operands = (scale, x2, noise)
        in_specs = [smem_spec, slab_spec,
                    pl.BlockSpec((2, br, 128), lambda i: (0, i, 0))]
    elif chan_type in (2, "rayleigh"):
        kn, kh = jax.random.split(key)
        noise = jax.random.normal(kn, (2, rows_pad, 128), dtype=jnp.float32)
        hri = jax.random.normal(kh, (2, rows_pad, 128), dtype=jnp.float32)
        # H = sqrt(Hr^2 + Hi^2) / sqrt(2), one coefficient per complex element.
        h = jnp.sqrt(hri[0] * hri[0] + hri[1] * hri[1]) * jnp.float32(1.0 / math.sqrt(2.0))
        kernel = _rayleigh_kernel
        operands = (scale, x2, noise, h)
        in_specs = [smem_spec, slab_spec,
                    pl.BlockSpec((2, br, 128), lambda i: (0, i, 0)),
                    pl.BlockSpec((br, 128), lambda i: (i, 0))]
    else:
        raise ValueError(f"unknown chan_type: {chan_type!r}")

    # --- pass 2: fused elementwise channel, pipelined & megacore-parallel -----
    out2 = pl.pallas_call(
        kernel,
        out_shape=jax.ShapeDtypeStruct((2, rows_pad, 128), jnp.float32),
        grid=grid,
        in_specs=in_specs,
        out_specs=pl.BlockSpec((2, br, 128), lambda i: (0, i, 0)),
        compiler_params=_tpu_params("parallel"),
    )(*operands)

    out_flat = jnp.concatenate([out2[0].reshape(-1)[:Lh],
                                out2[1].reshape(-1)[:Lh]])
    return out_flat.reshape(orig_shape).astype(orig_dtype)


if __name__ == "__main__":
    key = jax.random.PRNGKey(0)
    # NCHW-style input, as produced by the encoder feeding this channel model.
    x = jax.random.normal(key, (2, 4, 16, 16), dtype=jnp.float32)
    snr_db = 10.0

    out_awgn = channel_forward(x, snr_db, seed=0, chan_type="awgn")
    out_ray = channel_forward(x, snr_db, seed=1, chan_type="rayleigh")

    jax.block_until_ready(out_awgn)
    jax.block_until_ready(out_ray)

    assert out_awgn.shape == x.shape and out_awgn.dtype == x.dtype
    assert out_ray.shape == x.shape and out_ray.dtype == x.dtype
    assert bool(jnp.all(jnp.isfinite(out_awgn))) and bool(jnp.all(jnp.isfinite(out_ray)))
    # AWGN output should be x + noise, i.e. not identical to x but close in power.
    assert bool(jnp.any(jnp.abs(out_awgn - x) > 0))
    print("KERNEL_OK")
</pallas_src>

<mosaic_0001>
module attributes {stable_mosaic.version = 11 : i64} {
  func.func @_sumsq_kernel(%arg0: i32, %arg1: memref<2x8x128xf32, #tpu.memory_space<vmem>>, %arg2: memref<1x1xf32, #tpu.memory_space<smem>>) attributes {dimension_semantics = [#tpu.dimension_semantics<arbitrary>], iteration_bounds = array<i64: 1>, scalar_prefetch = 0 : i64, scratch_operands = 0 : i64, tpu.core_type = #tpu.core_type<tc>, window_params = [{transform_indices = @transform_0, window_bounds = array<i64: 2, 8, 128>}, {transform_indices = @transform_1, window_bounds = array<i64: 1, 1>}]} {
    %c0_i32 = arith.constant 0 : i32
    %0 = arith.cmpi eq, %arg0, %c0_i32 : i32
    %1 = arith.extui %0 : i1 to i32
    %c0_i32_0 = arith.constant 0 : i32
    %2 = arith.cmpi ne, %1, %c0_i32_0 : i32
    scf.if %2 {
      %cst_7 = arith.constant 0.000000e+00 : f32
      %c0_8 = arith.constant 0 : index
      %c0_9 = arith.constant 0 : index
      %12 = memref.load %arg2[%c0_8, %c0_9] : memref<1x1xf32, #tpu.memory_space<smem>>
      memref.store %cst_7, %arg2[%c0_8, %c0_9] : memref<1x1xf32, #tpu.memory_space<smem>>
    } else {
    }
    %c0 = arith.constant 0 : index
    %c0_1 = arith.constant 0 : index
    %c0_2 = arith.constant 0 : index
    %3 = vector.load %arg1[%c0, %c0_1, %c0_2] : memref<2x8x128xf32, #tpu.memory_space<vmem>>, vector<2x8x128xf32>
    %c0_3 = arith.constant 0 : index
    %c0_4 = arith.constant 0 : index
    %4 = memref.load %arg2[%c0_3, %c0_4] : memref<1x1xf32, #tpu.memory_space<smem>>
    %5 = arith.mulf %3, %3 : vector<2x8x128xf32>
    %6 = vector.shape_cast %5 : vector<2x8x128xf32> to vector<1x2x8x128xf32>
    %cst = arith.constant dense<0.000000e+00> : vector<1xf32>
    %7 = vector.multi_reduction <add>, %6, %cst [1, 2, 3] : vector<1x2x8x128xf32> to vector<1xf32>
    %8 = vector.shape_cast %7 : vector<1xf32> to vector<1x1x1x1xf32>
    %9 = vector.extract %8[0, 0, 0, 0] : f32 from vector<1x1x1x1xf32>
    %10 = arith.addf %4, %9 : f32
    %c0_5 = arith.constant 0 : index
    %c0_6 = arith.constant 0 : index
    %11 = memref.load %arg2[%c0_5, %c0_6] : memref<1x1xf32, #tpu.memory_space<smem>>
    memref.store %10, %arg2[%c0_5, %c0_6] : memref<1x1xf32, #tpu.memory_space<smem>>
    return
  }
  func.func @transform_0(%arg0: i32) -> (i32, i32, i32) {
    %c0_i32 = arith.constant 0 : i32
    %c0_i32_0 = arith.constant 0 : i32
    %c0_i32_1 = arith.constant 0 : i32
    return %c0_i32, %arg0, %c0_i32_0 : i32, i32, i32
  }
  func.func @transform_1(%arg0: i32) -> (i32, i32) {
    %c0_i32 = arith.constant 0 : i32
    %c0_i32_0 = arith.constant 0 : i32
    %c0_i32_1 = arith.constant 0 : i32
    return %c0_i32, %c0_i32_0 : i32, i32
  }
}

</mosaic_0001>

<bundles_post_ra>
// kernel: tpu_custom_call.1
= control target key start
LH: loop header
LB: loop body
LE: loop exit
PB: predicated region body
PF: predicated region fallthrough
CT: control target
= control target key end

     0   :  { %6 = vsyncpa [#allocation3], 0  ;;  %s142_s0 = inlined_call_operand.hbm [shape: f32[2,8,128], index: 0, kind: input, shape index: {}]   ;;  %s143_s1 = inlined_call_operand.hbm [shape: f32[1,1], index: 1, kind: output, shape index: {}]  }
   0x1   :  { %7 = vsyncpa [#allocation4], 0  ;;  %s104_s6 = smov [#allocation2]   ;;  %s68_s10 = scalar_lea.hbm %s142_s0, 256 }
   0x2   :  { %s13_s7 = sshll.u32 %s104_s6, 4  ;;  %p69_p0 = scmp.ne.s32.totalorder %s142_s0, %s68_s10  ;;  %s14_s7 = int_to_ptr.vmem [resolvable:$true] %s13_s7 }
   0x3   :  { %p72_p1 = scmp.lt.u32.totalorder %s68_s10, %s142_s0 }
   0x5   :  { %p74_p2 = pnand %p72_p1, %p69_p0 }
   0x7   :  { %77 = shalt.err (!%p74_p2)
}
   0x8   :  { %s78_s15 = scalar_lea.vmem %s14_s7, 256  ;;  %p83_p4 = scmp.lt.s32.totalorder %s14_s7, %s14_s7 }
   0x9   :  { %p79_p3 = scmp.ne.s32.totalorder %s14_s7, %s78_s15  ;;  %p84_p5 = scmp.lt.s32.totalorder %s78_s15, %s78_s15 }
   0xb   :  { %p85_p6 = por %p84_p5, %p83_p4 }
   0xd   :  { %p86_p7 = pnand %p85_p6, %p79_p3 }
   0xf   :  { %89 = shalt.err (!%p86_p7)
}
  0x10   :  { %s105_s16 = smov 128   ;;  %s106_s17 = smov 8  }
  0x11   :  { %19 = dma.hbm_to_vmem [thread:$0]  %s142_s0, 256, %s14_s7, [#allocation3], %s105_s16, %s105_s16, %s106_s17  }
  0x12   :  { %100 = dma.done.wait [#allocation3], 256  }
  0x13   :  { %101 = vsyncadd [#allocation3], 4294967040  ;;  %v29_v0 = vld [vmem:[#allocation2] sm:$0xff]  ;;  %v30_v1 = vld [vmem:[#allocation2 + $0x8] sm:$0xff]  ;;  %s90_s22 = scalar_lea.hbm %s143_s1, 16 }
  0x14   :  { %v32_v2 = vmul.f32 %v29_v0, %v29_v0  ;;  %v33_v3 = vmul.f32 %v30_v1, %v30_v1  ;;  %p91_p8 = scmp.ne.s32.totalorder %s143_s1, %s90_s22  ;;  %p94_p9 = scmp.lt.u32.totalorder %s90_s22, %s143_s1 }
  0x16   :  { %v34_v4 = vadd.f32 %v33_v3, %v32_v2  ;;  %p96_p10 = pnand %p94_p9, %p91_p8 }
  0x18   :  { %35 = vadd.xlane.f32.xlu0 %v34_v4 }
  0xa5   :  { %v36_v5 = vpop.xlane.xlu0 %35 }
  0xa6   :  { %v37_v6 = vrot.slane %v36_v5, 4 }
  0xa8   :  { %v38_v7 = vadd.f32 %v37_v6, %v36_v5 }
  0xaa   :  { %v39_v8 = vrot.slane %v38_v7, 2 }
  0xac   :  { %v40_v9 = vadd.f32 %v39_v8, %v38_v7 }
  0xae   :  { %v41_v10 = vrot.slane %v40_v9, 1 }
  0xb0   :  { %v42_v11 = vadd.f32 %v41_v10, %v40_v9 }
  0xb2   :  { %61 = vpush %v42_v11 }
  0xe3   :  { %s62_s20 = spop %61 }
  0xe4   :  { %46 = sst [smem:[#allocation5]] %s62_s20 }
  0xe5   :  { %99 = shalt.err (!%p96_p10)
}
  0xe6   :  { %s107_s27 = smov [#allocation5]  }
  0xe7   :  { %54 = dma.smem_to_hbm %s107_s27, 16, %s143_s1, [#allocation4]  }
  0xe8   :  { %102 = dma.done.wait [#allocation4], 16  }
  0xe9   :  { %103 = vsyncadd [#allocation4], 4294967280 }
  0xea   :  { %58 = sfence }
  0xeb   :  { %59 = vsyncpa [#allocation3], 1 }
  0xec   :  { %60 = vsyncpa [#allocation4], 1 }

</bundles_post_ra>
